<compile_context>
chip_gen: v5e
topology: v5e:2x2
jax: 0.10.0
libtpu: 0.0.40
codegen_flags: <defaults>
</compile_context>

<pallas_src>
import functools

import jax
import jax.numpy as jnp
from jax.experimental import pallas as pl
from jax.experimental.pallas import tpu as pltpu


# --------------------------------------------------------------------------
# Kernels
# --------------------------------------------------------------------------
def _se_fused_kernel(x_ref, w1_ref, w2_ref, o_ref):
    """Single-pass SE. x_ref/o_ref: (bb, C, HW); w1_ref: (Cr, C); w2_ref: (C, Cr)."""
    bb, _, hw = x_ref.shape
    inv_hw = jnp.float32(1.0 / hw)
    ones_col = jnp.ones((hw, 1), dtype=x_ref.dtype)        # MXU pooling vector
    w1 = w1_ref[...].astype(jnp.float32)                   # (Cr, C)
    w2 = w2_ref[...].astype(jnp.float32)                   # (C, Cr)

    for b in range(bb):                                     # bb is small & static
        xb = x_ref[b]                                       # (C, HW), I/O dtype

        # ---- squeeze: global average pool on the MXU, f32 accumulation ----
        pooled = jnp.dot(xb, ones_col,
                         preferred_element_type=jnp.float32) * inv_hw     # (C, 1)

        # ---- excitation: Linear -> ReLU -> Linear -> Sigmoid, all f32,
        #      column-vector shaped (no sublane<->lane relayouts) ----
        h = jnp.maximum(jnp.dot(w1, pooled,
                                preferred_element_type=jnp.float32), 0.0)  # (Cr,1)
        s = jax.nn.sigmoid(jnp.dot(w2, h,
                                   preferred_element_type=jnp.float32))    # (C, 1)

        # ---- scale: broadcast the gate over the spatial (lane) axis ----
        o_ref[b] = xb * s.astype(o_ref.dtype)               # (C, HW)


def _pool_excite_kernel(inv_hw, x_ref, w1_ref, w2_ref, g_ref, acc_ref):
    """Two-pass fallback, pass 1: tiled pooling + excitation.

    x_ref: (1, C, thw); w1_ref: (Cr, C); w2_ref: (C, Cr);
    g_ref: (1, C, 1) f32 gate output; acc_ref: VMEM (C, 1) f32 accumulator.
    Grid = (B, HW // thw); spatial (reduction) axis is last / "arbitrary".
    """
    j = pl.program_id(1)

    @pl.when(j == 0)
    def _():
        acc_ref[...] = jnp.zeros_like(acc_ref)

    thw = x_ref.shape[-1]
    ones_col = jnp.ones((thw, 1), dtype=x_ref.dtype)
    acc_ref[...] += jnp.dot(x_ref[0], ones_col,
                            preferred_element_type=jnp.float32)            # (C, 1)

    @pl.when(j == pl.num_programs(1) - 1)
    def _():
        pooled = acc_ref[...] * jnp.float32(inv_hw)                        # (C, 1)
        w1 = w1_ref[...].astype(jnp.float32)
        w2 = w2_ref[...].astype(jnp.float32)
        h = jnp.maximum(jnp.dot(w1, pooled,
                                preferred_element_type=jnp.float32), 0.0)  # (Cr,1)
        g_ref[0] = jax.nn.sigmoid(jnp.dot(w2, h,
                                          preferred_element_type=jnp.float32))


def _scale_kernel(x_ref, g_ref, o_ref):
    """Two-pass fallback, pass 2: out = x * gate (gate broadcast over lanes)."""
    o_ref[...] = x_ref[...] * g_ref[...].astype(o_ref.dtype)


# --------------------------------------------------------------------------
# Planning helpers (trace-time, static shapes)
# --------------------------------------------------------------------------
def _vmem_budget():
    try:
        cap = int(pltpu.get_tpu_info().vmem_capacity_bytes)
    except Exception:
        cap = 64 * 1024 * 1024          # conservative: v7x per-TensorCore VMEM
    return int(cap * 0.75)


def _fused_plan(B, C, HW, itemsize, Cr, budget):
    """Return (fits, bb, vmem_limit) for the single-pass path."""
    slab = C * HW * itemsize            # one batch of x (== one batch of out)
    w_bytes = 2 * (C * Cr * 4) * 2      # both weight matrices, double-buffered
    slack = 2 << 20
    if 4 * slab + w_bytes + slack > budget:
        return False, 1, budget

    bb = 1
    for cand in range(1, min(B, 8) + 1):
        if B % cand:
            continue
        if 4 * cand * slab + w_bytes + slack > budget:   # in + out, double-buffered
            continue
        if (B // cand) >= min(2, B):                     # >= 2 programs for megacore
            bb = cand

    need = 4 * bb * slab + w_bytes + slack
    return True, bb, int(min(budget, max(2 * need, 32 * 1024 * 1024)))


def _two_pass_plan(C, HW, itemsize, budget, forced_tile=None):
    """Return (thw, vmem_limit) for the tiled two-pass path."""
    if forced_tile is not None:
        thw = int(forced_tile)
    else:
        slack = 4 << 20
        cap = max(1, (budget - slack) // (4 * C * itemsize))
        thw = 1
        # Prefer lane-dense (multiple-of-128) spatial tiles that divide HW.
        for d in range(128 * (min(cap, HW) // 128), 0, -128):
            if HW % d == 0:
                thw = d
                break
        if thw == 1:
            for d in range(min(cap, HW), 0, -1):
                if HW % d == 0:
                    thw = d
                    break
    need = 4 * C * thw * itemsize + (4 << 20)
    return thw, int(min(budget, max(2 * need, 32 * 1024 * 1024)))


# --------------------------------------------------------------------------
# pallas_call wrappers
# --------------------------------------------------------------------------
def _se_fused(xr, w1, w2, bb, vmem_limit):
    B, C, HW = xr.shape
    Cr = w1.shape[0]
    return pl.pallas_call(
        _se_fused_kernel,
        out_shape=jax.ShapeDtypeStruct((B, C, HW), xr.dtype),
        grid_spec=pltpu.PrefetchScalarGridSpec(
            num_scalar_prefetch=0,
            grid=(B // bb,),
            in_specs=[
                pl.BlockSpec((bb, C, HW), lambda i: (i, 0, 0)),
                pl.BlockSpec((Cr, C), lambda i: (0, 0)),
                pl.BlockSpec((C, Cr), lambda i: (0, 0)),
            ],
            out_specs=pl.BlockSpec((bb, C, HW), lambda i: (i, 0, 0)),
        ),
        compiler_params=pltpu.CompilerParams(
            dimension_semantics=("parallel",),
            vmem_limit_bytes=vmem_limit),
    )(xr, w1, w2)


def _se_two_pass(xr, w1, w2, thw, vmem_limit):
    B, C, HW = xr.shape
    Cr = w1.shape[0]
    n_sp = HW // thw

    # Pass 1: tiled pooling + excitation -> per-batch gate (B, C, 1) in f32.
    gates = pl.pallas_call(
        functools.partial(_pool_excite_kernel, 1.0 / HW),
        out_shape=jax.ShapeDtypeStruct((B, C, 1), jnp.float32),
        grid_spec=pltpu.PrefetchScalarGridSpec(
            num_scalar_prefetch=0,
            grid=(B, n_sp),
            in_specs=[
                pl.BlockSpec((1, C, thw), lambda i, j: (i, 0, j)),
                pl.BlockSpec((Cr, C), lambda i, j: (0, 0)),
                pl.BlockSpec((C, Cr), lambda i, j: (0, 0)),
            ],
            out_specs=pl.BlockSpec((1, C, 1), lambda i, j: (i, 0, 0)),
            scratch_shapes=[pltpu.VMEM((C, 1), jnp.float32)],
        ),
        compiler_params=pltpu.CompilerParams(
            dimension_semantics=("parallel", "arbitrary"),
            vmem_limit_bytes=vmem_limit),
    )(xr, w1, w2)

    # Pass 2: tiled elementwise scale, gate broadcast over the spatial axis.
    return pl.pallas_call(
        _scale_kernel,
        out_shape=jax.ShapeDtypeStruct((B, C, HW), xr.dtype),
        grid_spec=pltpu.PrefetchScalarGridSpec(
            num_scalar_prefetch=0,
            grid=(B, n_sp),
            in_specs=[
                pl.BlockSpec((1, C, thw), lambda i, j: (i, 0, j)),
                pl.BlockSpec((1, C, 1), lambda i, j: (i, 0, 0)),
            ],
            out_specs=pl.BlockSpec((1, C, thw), lambda i, j: (i, 0, j)),
        ),
        compiler_params=pltpu.CompilerParams(
            dimension_semantics=("parallel", "parallel"),
            vmem_limit_bytes=vmem_limit),
    )(xr, gates)


@functools.partial(jax.jit, static_argnames=("force_two_pass", "_force_spatial_tile"))
def se_attention(x, w1, w2, *, force_two_pass=False, _force_spatial_tile=None):
    """SEAttention forward.

    x: (B, C, H, W); w1: (C//r, C); w2: (C, C//r)  (PyTorch (out, in) layout).
    """
    B, C, H, W = x.shape
    HW = H * W
    Cr = w1.shape[0]
    assert w1.shape == (Cr, C) and w2.shape == (C, Cr)

    xr = x.reshape(B, C, HW)                       # free reshape, NCHW-native
    itemsize = jnp.dtype(x.dtype).itemsize
    budget = _vmem_budget()
    fits, bb, vmem_limit = _fused_plan(B, C, HW, itemsize, Cr, budget)

    if fits and not force_two_pass:
        out = _se_fused(xr, w1, w2, bb, vmem_limit)
    else:
        thw, vmem_limit = _two_pass_plan(C, HW, itemsize, budget,
                                         forced_tile=_force_spatial_tile)
        assert HW % thw == 0, "spatial tile must divide H*W"
        out = _se_two_pass(xr, w1, w2, thw, vmem_limit)
    return out.reshape(B, C, H, W)


# --------------------------------------------------------------------------
# Reference + self-test
# --------------------------------------------------------------------------
def _reference(x, w1, w2):
    """Pure-JAX SEAttention forward (f32 math), PyTorch (out, in) weights."""
    xf = x.astype(jnp.float32)
    pooled = jnp.mean(xf, axis=(2, 3))                     # (B, C)
    h = jnp.maximum(pooled @ w1.T, 0.0)                    # (B, Cr)
    s = jax.nn.sigmoid(h @ w2.T)                           # (B, C)
    return xf * s[:, :, None, None]


if __name__ == "__main__":
    key = jax.random.PRNGKey(0)

    def check(B, C, H, W, reduction, w_std, dtype, atol, rtol, tag,
              force_two_pass=False, spatial_tile=None):
        Cr = C // reduction
        kx, k1, k2 = jax.random.split(jax.random.fold_in(key, tag), 3)
        x = jax.random.normal(kx, (B, C, H, W), dtype=jnp.float32)
        w1 = w_std[0] * jax.random.normal(k1, (Cr, C), dtype=jnp.float32)
        w2 = w_std[1] * jax.random.normal(k2, (C, Cr), dtype=jnp.float32)
        xd = x.astype(dtype)

        out = jax.block_until_ready(
            se_attention(xd, w1, w2, force_two_pass=force_two_pass,
                         _force_spatial_tile=spatial_tile))
        ref = _reference(xd, w1, w2)

        assert out.shape == (B, C, H, W) and out.dtype == dtype
        err = jnp.max(jnp.abs(out.astype(jnp.float32) - ref))
        assert jnp.allclose(out.astype(jnp.float32), ref, atol=atol, rtol=rtol), (
            f"case {tag}: mismatch vs reference, max_abs_err={err}")

    # 1) fused path, tiny weights (init_weights std=0.001), tight tolerance.
    check(2, 64, 16, 16, 16, (0.001, 0.001), jnp.float32, 1e-4, 1e-4, tag=0)
    # 2) fused path, large weights (gates away from 0.5); tolerance covers the
    #    MXU's default bf16-pass precision in the tiny excitation matmuls.
    check(2, 64, 16, 16, 16, (0.5, 2.0), jnp.float32, 3e-2, 3e-2, tag=1)
    # 3) fused path, bf16 I/O, batch-blocked (bb > 1).
    check(8, 128, 8, 8, 16, (0.5, 2.0), jnp.bfloat16, 6e-2, 6e-2, tag=2)
    # 4) two-pass fallback forced, f32, 2 spatial tiles (exercises the resident
    #    pooled accumulator + finalize-on-last-step path).
    check(2, 64, 16, 16, 16, (0.5, 2.0), jnp.float32, 3e-2, 3e-2, tag=3,
          force_two_pass=True, spatial_tile=128)
    # 5) two-pass fallback forced, bf16 I/O.
    check(4, 128, 16, 16, 16, (0.5, 2.0), jnp.bfloat16, 6e-2, 6e-2, tag=4,
          force_two_pass=True, spatial_tile=128)

    print("KERNEL_OK")
</pallas_src>

<mosaic_0001>
module attributes {stable_mosaic.version = 11 : i64} {
  func.func @_se_fused_kernel(%arg0: i32, %arg1: memref<1x64x256xf32, #tpu.memory_space<vmem>>, %arg2: memref<4x64xf32, #tpu.memory_space<vmem>>, %arg3: memref<64x4xf32, #tpu.memory_space<vmem>>, %arg4: memref<1x64x256xf32, #tpu.memory_space<vmem>>) attributes {dimension_semantics = [#tpu.dimension_semantics<parallel>], iteration_bounds = array<i64: 2>, scalar_prefetch = 0 : i64, scratch_operands = 0 : i64, tpu.core_type = #tpu.core_type<tc>, window_params = [{transform_indices = @transform_0, window_bounds = array<i64: 1, 64, 256>}, {pipeline_mode = #tpu.pipeline_mode<synchronous>, transform_indices = @transform_1, window_bounds = array<i64: 4, 64>}, {pipeline_mode = #tpu.pipeline_mode<synchronous>, transform_indices = @transform_2, window_bounds = array<i64: 64, 4>}, {transform_indices = @transform_3, window_bounds = array<i64: 1, 64, 256>}]} {
    %cst = arith.constant 1.000000e+00 : f32
    %0 = vector.broadcast %cst : f32 to vector<256x1xf32>
    %c0 = arith.constant 0 : index
    %c0_0 = arith.constant 0 : index
    %1 = vector.load %arg2[%c0, %c0_0] : memref<4x64xf32, #tpu.memory_space<vmem>>, vector<4x64xf32>
    %c0_1 = arith.constant 0 : index
    %c0_2 = arith.constant 0 : index
    %2 = vector.load %arg3[%c0_1, %c0_2] : memref<64x4xf32, #tpu.memory_space<vmem>>, vector<64x4xf32>
    %c0_3 = arith.constant 0 : index
    %c0_4 = arith.constant 0 : index
    %c0_5 = arith.constant 0 : index
    %3 = vector.load %arg1[%c0_3, %c0_4, %c0_5] : memref<1x64x256xf32, #tpu.memory_space<vmem>>, vector<1x64x256xf32>
    %4 = vector.shape_cast %3 : vector<1x64x256xf32> to vector<64x256xf32>
    %cst_6 = arith.constant dense<0.000000e+00> : vector<64x1xf32>
    %5 = tpu.matmul %4, %0, %cst_6 {dimension_numbers = #tpu.dot_dimension_numbers<[1], [0], [0], [1], [0, 0, 1, 1], [], []>} : vector<64x256xf32>, vector<256x1xf32>, vector<64x1xf32> -> vector<64x1xf32>
    %cst_7 = arith.constant 3.906250e-03 : f32
    %6 = vector.broadcast %cst_7 : f32 to vector<64x1xf32>
    %7 = arith.mulf %5, %6 : vector<64x1xf32>
    %cst_8 = arith.constant dense<0.000000e+00> : vector<4x1xf32>
    %8 = tpu.matmul %1, %7, %cst_8 {dimension_numbers = #tpu.dot_dimension_numbers<[1], [0], [0], [1], [0, 0, 1, 1], [], []>} : vector<4x64xf32>, vector<64x1xf32>, vector<4x1xf32> -> vector<4x1xf32>
    %cst_9 = arith.constant 0.000000e+00 : f32
    %9 = vector.broadcast %cst_9 : f32 to vector<4x1xf32>
    %10 = arith.maximumf %8, %9 : vector<4x1xf32>
    %cst_10 = arith.constant dense<0.000000e+00> : vector<64x1xf32>
    %11 = tpu.matmul %2, %10, %cst_10 {dimension_numbers = #tpu.dot_dimension_numbers<[1], [0], [0], [1], [0, 0, 1, 1], [], []>} : vector<64x4xf32>, vector<4x1xf32>, vector<64x1xf32> -> vector<64x1xf32>
    %12 = arith.negf %11 : vector<64x1xf32>
    %13 = math.exp %12 : vector<64x1xf32>
    %cst_11 = arith.constant 1.000000e+00 : f32
    %14 = vector.broadcast %cst_11 : f32 to vector<64x1xf32>
    %15 = arith.addf %14, %13 : vector<64x1xf32>
    %16 = arith.divf %14, %15 : vector<64x1xf32>
    %17 = vector.broadcast %16 : vector<64x1xf32> to vector<64x256xf32>
    %18 = arith.mulf %4, %17 : vector<64x256xf32>
    %c0_12 = arith.constant 0 : index
    %c0_13 = arith.constant 0 : index
    %c0_14 = arith.constant 0 : index
    %19 = vector.load %arg4[%c0_12, %c0_13, %c0_14] : memref<1x64x256xf32, #tpu.memory_space<vmem>>, vector<1x64x256xf32>
    %20 = vector.shape_cast %19 : vector<1x64x256xf32> to vector<64x256xf32>
    %21 = vector.shape_cast %18 : vector<64x256xf32> to vector<1x64x256xf32>
    tpu.vector_store %arg4[%c0_12, %c0_13, %c0_14], %21 {strides = array<i32>} : memref<1x64x256xf32, #tpu.memory_space<vmem>>, vector<1x64x256xf32>,
    return
  }
  func.func @transform_0(%arg0: i32) -> (i32, i32, i32) {
    %c0_i32 = arith.constant 0 : i32
    %c0_i32_0 = arith.constant 0 : i32
    %c0_i32_1 = arith.constant 0 : i32
    return %arg0, %c0_i32, %c0_i32_0 : i32, i32, i32
  }
  func.func @transform_1(%arg0: i32) -> (i32, i32) {
    %c0_i32 = arith.constant 0 : i32
    %c0_i32_0 = arith.constant 0 : i32
    %c0_i32_1 = arith.constant 0 : i32
    return %c0_i32, %c0_i32_0 : i32, i32
  }
  func.func @transform_2(%arg0: i32) -> (i32, i32) {
    %c0_i32 = arith.constant 0 : i32
    %c0_i32_0 = arith.constant 0 : i32
    %c0_i32_1 = arith.constant 0 : i32
    return %c0_i32, %c0_i32_0 : i32, i32
  }
  func.func @transform_3(%arg0: i32) -> (i32, i32, i32) {
    %c0_i32 = arith.constant 0 : i32
    %c0_i32_0 = arith.constant 0 : i32
    %c0_i32_1 = arith.constant 0 : i32
    return %arg0, %c0_i32, %c0_i32_0 : i32, i32, i32
  }
}

</mosaic_0001>

<bundles_post_ra>
// kernel: se_attention.1
= control target key start
LH: loop header
LB: loop body
LE: loop exit
PB: predicated region body
PF: predicated region fallthrough
CT: control target
= control target key end

     0   :  { %s798_s12 = smov 0   ;;  %s1025_s0 = inlined_call_operand.vmem [shape: f32[2,64,256], index: 0, kind: input, shape index: {}]   ;;  %s1026_s1 = inlined_call_operand.vmem [shape: f32[4,64], index: 1, kind: input, shape index: {}]   ;;  %s1027_s2 = inlined_call_operand.vmem [shape: f32[64,4], index: 2, kind: input, shape index: {}]   ;;  %s1028_s3 = inlined_call_operand.vmem [shape: f32[2,64,256], index: 3, kind: output, shape index: {}]  }
   0x1 LB: > { %s660_s13 = sadd.s32 4294967295, %s774_s12   ;;  %p664_p0 = scmp.ge.s32.totalorder %s774_s12, 1  ;;  %s774_s12 = sphi %s798_s12, %s13_s12  }
   0x2   : > { %p137_p1 = scmp.lt.s32.totalorder %s774_s12, 3 }
   0x4   : > { %p138_p2 = pnand %p664_p0, %p137_p1 }
   0x5   : > { %p161_p3 = scmp.lt.s32.totalorder (!%p138_p2), %s660_s13, 1 }
   0x6   : > { %141 = sbr.rel (%p138_p2) target bundleno = 704 (0x2c0), region = 32 }
   0xb   : > { %v776_v0 = vmov 1.0   ;;  %s1030_s13 = smov (!%p161_p3, %s660_s13), 1  ;;  %v171_v49 = vld [vmem:[%s1026_s1] sm:$0xf]  ;;  %vm286_vm0 = vcmask 523264   ;;  %vm336_vm1 = vcmask 1043456  }
   0xc   : > { %691 = vmatpush.msra.mxu2 %v776_v0  ;;  %196 = vmatpush.msra.mxu0 %v776_v0  ;;  %s689_s14 = sshll.u32 %s1030_s13, 7  ;;  %v172_v52 = vld [vmem:[%s1027_s2] sm:$0xff]  ;;  %vm311_vm2 = vcmask 31744   ;;  %v173_v53 = vld [vmem:[%s1027_s2 + $0x8] sm:$0xff]  ;;  %v174_v54 = vld [vmem:[%s1027_s2 + $0x10] sm:$0xff]  ;;  %v777_v60 = vmov 0  }
   0xd   : > { %237 = vmatpush.msra.mxu1 %v776_v0  ;;  %s859_s17 = scalar_lea.vmem %s1025_s0, %s689_s14  ;;  %v175_v55 = vld [vmem:[%s1027_s2 + $0x18] sm:$0xff]  ;;  %v176_v56 = vld [vmem:[%s1027_s2 + $0x20] sm:$0xff]  ;;  %v177_v57 = vld [vmem:[%s1027_s2 + $0x28] sm:$0xff]  ;;  %733 = vset.pattern.permute.xlu0 %v777_v60  ;;  %s988_s11 = scalar_lea.vmem %s1028_s3, %s689_s14 }
   0xe   : > { %692 = vmatpush.msra.mxu2 %v776_v0  ;;  %197 = vmatpush.msra.mxu0 %v776_v0  ;;  %v866_v1 = vld [vmem:[%s859_s17] sm:$0xff]  ;;  %v869_v2 = vld [vmem:[%s859_s17 + $0x8] sm:$0xff]  ;;  %v885_v4 = vld [vmem:[%s859_s17 + $0x10] sm:$0xff] }
   0xf   : > { %238 = vmatpush.msra.mxu1 %v776_v0  ;;  %v876_v3 = vld [vmem:[%s859_s17 + $0x60] sm:$0xff]  ;;  %v888_v5 = vld [vmem:[%s859_s17 + $0x18] sm:$0xff]  ;;  %v892_v6 = vld [vmem:[%s859_s17 + $0x70] sm:$0xff]  ;;  %734 = vset.pattern.permute.xlu1 %v777_v60 }
  0x10   : > { %693 = vmatpush.msra.mxu2 %v776_v0  ;;  %198 = vmatpush.msra.mxu0 %v776_v0  ;;  %v901_v7 = vld [vmem:[%s859_s17 + $0x20] sm:$0xff]  ;;  %v904_v8 = vld [vmem:[%s859_s17 + $0x28] sm:$0xff]  ;;  %v913_v9 = vld [vmem:[%s859_s17 + $0x30] sm:$0xff] }
  0x11   : > { %239 = vmatpush.msra.mxu1 %v776_v0  ;;  %v916_v10 = vld [vmem:[%s859_s17 + $0x38] sm:$0xff]  ;;  %v924_v11 = vld [vmem:[%s859_s17 + $0x68] sm:$0xff]  ;;  %v928_v12 = vld [vmem:[%s859_s17 + $0x40] sm:$0xff]  ;;  %735 = vset.pattern.permute.xlu2 %v777_v60 }
  0x12   : > { %694 = vmatpush.msra.mxu2 %v776_v0  ;;  %199 = vmatpush.msra.mxu0 %v776_v0  ;;  %v931_v13 = vld [vmem:[%s859_s17 + $0x48] sm:$0xff]  ;;  %v937_v14 = vld [vmem:[%s859_s17 + $0x78] sm:$0xff]  ;;  %v940_v15 = vld [vmem:[%s859_s17 + $0x50] sm:$0xff] }
  0x13   : > { %240 = vmatpush.msra.mxu1 %v776_v0  ;;  %v943_v16 = vld [vmem:[%s859_s17 + $0x58] sm:$0xff]  ;;  %v178_v58 = vld [vmem:[%s1027_s2 + $0x30] sm:$0xff] }
  0x14   : > { %695 = vmatpush.msra.mxu2 %v776_v0  ;;  %200 = vmatpush.msra.mxu0 %v776_v0  ;;  %v179_v59 = vld [vmem:[%s1027_s2 + $0x38] sm:$0xff] }
  0x15   : > { %241 = vmatpush.msra.mxu1 %v776_v0 }
  0x16   : > { %696 = vmatpush.msra.mxu2 %v776_v0  ;;  %201 = vmatpush.msra.mxu0 %v776_v0 }
  0x17   : > { %242 = vmatpush.msra.mxu1 %v776_v0 }
  0x18   : > { %697 = vmatpush.msra.mxu2 %v776_v0  ;;  %202 = vmatpush.msra.mxu0 %v776_v0 }
  0x19   : > { %243 = vmatpush.msra.mxu1 %v776_v0 }
  0x1a   : > { %698 = vmatpush.msra.mxu2 %v776_v0  ;;  %203 = vmatpush.msra.mxu0 %v776_v0 }
  0x1b   : > { %244 = vmatpush.msra.mxu1 %v776_v0 }
  0x1c   : > { %699 = vmatpush.msra.mxu2 %v776_v0  ;;  %204 = vmatpush.msra.mxu0 %v776_v0 }
  0x1d   : > { %245 = vmatpush.msra.mxu1 %v776_v0 }
  0x1e   : > { %700 = vmatpush.msra.mxu2 %v776_v0  ;;  %205 = vmatpush.msra.mxu0 %v776_v0 }
  0x1f   : > { %246 = vmatpush.msra.mxu1 %v776_v0 }
  0x20   : > { %701 = vmatpush.msra.mxu2 %v776_v0  ;;  %206 = vmatpush.msra.mxu0 %v776_v0 }
  0x21   : > { %247 = vmatpush.msra.mxu1 %v776_v0 }
  0x22   : > { %702 = vmatpush.msra.mxu2 %v776_v0  ;;  %207 = vmatpush.msra.mxu0 %v776_v0 }
  0x23   : > { %248 = vmatpush.msra.mxu1 %v776_v0 }
  0x24   : > { %703 = vmatpush.msra.mxu2 %v776_v0  ;;  %208 = vmatpush.msra.mxu0 %v776_v0 }
  0x25   : > { %249 = vmatpush.msra.mxu1 %v776_v0 }
  0x26   : > { %704 = vmatpush.msra.mxu2 %v776_v0  ;;  %209 = vmatpush.msra.mxu0 %v776_v0 }
  0x27   : > { %250 = vmatpush.msra.mxu1 %v776_v0 }
  0x28   : > { %705 = vmatpush.msra.mxu2 %v776_v0  ;;  %210 = vmatpush.msra.mxu0 %v776_v0 }
  0x29   : > { %251 = vmatpush.msra.mxu1 %v776_v0 }
  0x2a   : > { %706 = vmatpush.msra.mxu2 %v776_v0  ;;  %211 = vmatpush.msra.mxu0 %v776_v0 }
  0x2b   : > { %252 = vmatpush.msra.mxu1 %v776_v0  ;;  %212 = vmatmul.f32.vlgmr.msra.gmra.mxu0 %v866_v1 }
  0x2c   : > { %707 = vmatpush.msrb.mxu2 %v776_v0  ;;  %253 = vmatmul.f32.vlgmr.msra.gmra.mxu1 %v869_v2 }
  0x2d   : > { %230 = vmatmul.f32.vlgmr.msra.gmra.mxu2 %v876_v3 }
  0x2e   : > { %708 = vmatpush.msrb.mxu2 %v776_v0 }
  0x30   : > { %709 = vmatpush.msrb.mxu2 %v776_v0 }
  0x32   : > { %710 = vmatpush.msrb.mxu2 %v776_v0 }
  0x33   : > { %215 = vmatmul.f32.gmra.mxu0 %v885_v4 }
  0x34   : > { %711 = vmatpush.msrb.mxu2 %v776_v0  ;;  %256 = vmatmul.f32.gmra.mxu1 %v888_v5 }
  0x35   : > { %233 = vmatmul.f32.gmra.mxu2 %v892_v6 }
  0x36   : > { %712 = vmatpush.msrb.mxu2 %v776_v0 }
  0x38   : > { %713 = vmatpush.msrb.mxu2 %v776_v0 }
  0x3a   : > { %714 = vmatpush.msrb.mxu2 %v776_v0 }
  0x3b   : > { %218 = vmatmul.f32.gmra.mxu0 %v901_v7 }
  0x3c   : > { %715 = vmatpush.msrb.mxu2 %v776_v0  ;;  %259 = vmatmul.f32.gmra.mxu1 %v904_v8 }
  0x3e   : > { %716 = vmatpush.msrb.mxu2 %v776_v0 }
  0x40   : > { %717 = vmatpush.msrb.mxu2 %v776_v0 }
  0x42   : > { %718 = vmatpush.msrb.mxu2 %v776_v0 }
  0x43   : > { %221 = vmatmul.f32.gmra.mxu0 %v913_v9 }
  0x44   : > { %719 = vmatpush.msrb.mxu2 %v776_v0  ;;  %262 = vmatmul.f32.gmra.mxu1 %v916_v10 }
  0x46   : > { %720 = vmatpush.msrb.mxu2 %v776_v0 }
  0x48   : > { %721 = vmatpush.msrb.mxu2 %v776_v0 }
  0x4a   : > { %722 = vmatpush.msrb.mxu2 %v776_v0 }
  0x4b   : > { %271 = vmatmul.f32.vlgmr.msrb.gmra.mxu2 %v924_v11  ;;  %224 = vmatmul.f32.gmra.mxu0 %v928_v12 }
  0x4c   : > { %265 = vmatmul.f32.gmra.mxu1 %v931_v13 }
  0x53   : > { %274 = vmatmul.f32.gmra.mxu2 %v937_v14  ;;  %227 = vmatmul.f32.gmra.mxu0 %v940_v15 }
  0x54   : > { %268 = vmatmul.f32.gmra.mxu1 %v943_v16 }
  0xa8   : > { %v213_v17 = vpop.f32.mrf.mxu0 }
  0xa9   : > { %v254_v18 = vpop.f32.mrf.mxu1 }
  0xaa   : > { %v255_v45 = vadd.f32 %v254_v18, %v213_v17 }
  0xac   : > { %v278_v48 = vmul.f32 0.00390625, %v255_v45 }
  0xb0   : > { %v216_v19 = vpop.f32.mrf.mxu0  ;;  %v231_v21 = vpop.f32.mrf.mxu2 }
  0xb1   : > { %v257_v20 = vpop.f32.mrf.mxu1 }
  0xb2   : > { %v258_v43 = vadd.f32 %v257_v20, %v216_v19 }
  0xb4   : > { %v279_v47 = vmul.f32 0.00390625, %v258_v43 }
  0xb8   : > { %v219_v22 = vpop.f32.mrf.mxu0  ;;  %v234_v26 = vpop.f32.mrf.mxu2 }
  0xb9   : > { %v260_v23 = vpop.f32.mrf.mxu1 }
  0xba   : > { %v261_v41 = vadd.f32 %v260_v23, %v219_v22 }
  0xbc   : > { %v280_v46 = vmul.f32 0.00390625, %v261_v41 }
  0xc0   : > { %v222_v24 = vpop.f32.mrf.mxu0 }
  0xc1   : > { %v263_v25 = vpop.f32.mrf.mxu1 }
  0xc2   : > { %v264_v40 = vadd.f32 %v263_v25, %v222_v24 }
  0xc4   : > { %v281_v44 = vmul.f32 0.00390625, %v264_v40 }
  0xc8   : > { %v225_v27 = vpop.f32.mrf.mxu0 }
  0xc9   : > { %v266_v28 = vpop.f32.mrf.mxu1 }
  0xca   : > { %v267_v38 = vadd.f32 %v266_v28, %v225_v27 }
  0xcc   : > { %v282_v42 = vmul.f32 0.00390625, %v267_v38 }
  0xce   : > { %v272_v29 = vpop.f32.mrf.mxu2 }
  0xcf   : > { %v273_v33 = vadd.f32 %v272_v29, %v231_v21 }
  0xd0   : > { %v228_v30 = vpop.f32.mrf.mxu0 }
  0xd1   : > { %v269_v31 = vpop.f32.mrf.mxu1  ;;  %v284_v37 = vmul.f32 0.00390625, %v273_v33 }
  0xd2   : > { %v270_v35 = vadd.f32 %v269_v31, %v228_v30 }
  0xd4   : > { %v283_v39 = vmul.f32 0.00390625, %v270_v35 }
  0xd6   : > { %v275_v32 = vpop.f32.mrf.mxu2 }
  0xd7   : > { %v276_v34 = vadd.f32 %v275_v32, %v234_v26 }
  0xd9   : > { %v285_v36 = vmul.f32 0.00390625, %v276_v34 }
  0xdb   : > { %298 = vmatpush.msra.mxu2 %v285_v36 }
  0xdd   : > { %299 = vmatpush.msra.mxu2 %v284_v37 }
  0xdf   : > { %300 = vmatpush.msra.mxu2 %v283_v39 }
  0xe1   : > { %301 = vmatpush.msra.mxu2 %v282_v42 }
  0xe3   : > { %302 = vmatpush.msra.mxu2 %v281_v44 }
  0xe5   : > { %303 = vmatpush.msra.mxu2 %v280_v46 }
  0xe7   : > { %304 = vmatpush.msra.mxu2 %v279_v47 }
  0xe9   : > { %305 = vmatpush.msra.mxu2 %v278_v48 }
  0xea   : > { %669 = vmatmul.msk.f32.vlgmr.msra.gmra.mxu2 %vm286_vm0, %v171_v49 }
 0x16d   : > { %v307_v50 = vpop.f32.mrf.mxu2 }
 0x16e   : > { %v310_v51 = vmax.f32 %v307_v50, 0.0 }
 0x170   : > { %670 = vmatpush.msk.msra.mxu3 %vm336_vm1, %v310_v51 }
 0x171   : > { %671 = vmatmul.msk.f32.vlgmr.msra.gmra.mxu3 %vm311_vm2, %v172_v52 }
 0x179   : > { %672 = vmatmul.msk.f32.gmra.mxu3 %vm311_vm2, %v173_v53 }
 0x181   : > { %673 = vmatmul.msk.f32.gmra.mxu3 %vm311_vm2, %v174_v54 }
 0x189   : > { %674 = vmatmul.msk.f32.gmra.mxu3 %vm311_vm2, %v175_v55 }
 0x191   : > { %675 = vmatmul.msk.f32.gmra.mxu3 %vm311_vm2, %v176_v56 }
 0x199   : > { %676 = vmatmul.msk.f32.gmra.mxu3 %vm311_vm2, %v177_v57 }
 0x1a1   : > { %677 = vmatmul.msk.f32.gmra.mxu3 %vm311_vm2, %v178_v58 }
 0x1a9   : > { %678 = vmatmul.msk.f32.gmra.mxu3 %vm311_vm2, %v179_v59 }
 0x1f4   : > { %v357_v61 = vpop.f32.mrf.mxu3 }
 0x1f5   : > { %v679_v62 = vmul.f32 -1.442695, %v357_v61 }
 0x1f7   : > { %736 = vpow2.f32 %v679_v62 }
 0x1fc   : > { %v360_v63 = vpop.f32.mrf.mxu3 }
 0x1fd   : > { %v737_v0 = vpop.eup %736  ;;  %v680_v17 = vmul.f32 -1.442695, %v360_v63 }
 0x1fe   : > { %v405_v18 = vadd.f32 1.0, %v737_v0 }
 0x1ff   : > { %738 = vpow2.f32 %v680_v17 }
 0x200   : > { %740 = vrcp.f32 %v405_v18  ;;  %v424_v26 = vand.u32 2147483648, %v405_v18  ;;  %v422_v28 = vand.u32 2147483647, %v405_v18  ;;  %vm418_vm4 = vweird.f32 %v405_v18 }
 0x202   : > { %v425_v35 = vor.u32 1.1754944e-38, %v424_v26  ;;  %vm423_vm6 = vcmp.eq.f32.partialorder %v422_v28, 8.507059e+37 }
 0x204   : > { %v363_v19 = vpop.f32.mrf.mxu3 }
 0x205   : > { %v739_v20 = vpop.eup %738  ;;  %v681_v21 = vmul.f32 -1.442695, %v363_v19 }
 0x206   : > { %v741_v22 = vpop.eup %740  ;;  %v406_v23 = vadd.f32 1.0, %v739_v20 }
 0x207   : > { %742 = vpow2.f32 %v681_v21  ;;  %v414_v24 = vmul.f32 %v741_v22, %v405_v18  ;;  %vm419_vm3 = vweird.f32 %v741_v22 }
 0x208   : > { %744 = vrcp.f32 %v406_v23  ;;  %vm420_vm5 = vmor %vm418_vm4, %vm419_vm3  ;;  %v439_v40 = vand.u32 2147483648, %v406_v23  ;;  %v437_v42 = vand.u32 2147483647, %v406_v23  ;;  %vm433_vm8 = vweird.f32 %v406_v23 }
 0x209   : > { %v415_v25 = vsub.f32 1.0, %v414_v24 }
 0x20a   : > { %v440_v49 = vor.u32 1.1754944e-38, %v439_v40  ;;  %vm438_vm10 = vcmp.eq.f32.partialorder %v437_v42, 8.507059e+37 }
 0x20b   : > { %v416_v27 = vmul.f32 %v741_v22, %v415_v25 }
 0x20c   : > { %v366_v29 = vpop.f32.mrf.mxu3 }
 0x20d   : > { %v743_v30 = vpop.eup %742  ;;  %v682_v31 = vmul.f32 -1.442695, %v366_v29  ;;  %v417_v32 = vadd.f32 %v741_v22, %v416_v27 }
 0x20e   : > { %v745_v33 = vpop.eup %744  ;;  %v407_v34 = vadd.f32 1.0, %v743_v30 }
 0x20f   : > { %746 = vpow2.f32 %v682_v31  ;;  %v421_v36 = vsel %vm420_vm5, %v741_v22, %v417_v32  ;;  %v429_v37 = vmul.f32 %v745_v33, %v406_v23  ;;  %vm434_vm7 = vweird.f32 %v745_v33 }
 0x210   : > { %748 = vrcp.f32 %v407_v34  ;;  %v426_v38 = vsel %vm423_vm6, %v425_v35, %v421_v36  ;;  %vm435_vm9 = vmor %vm433_vm8, %vm434_vm7  ;;  %v454_v54 = vand.u32 2147483648, %v407_v34  ;;  %v452_v56 = vand.u32 2147483647, %v407_v34 }
 0x211   : > { %535 = vperm.xlu0 %733, %v426_v38   ;;  %v430_v39 = vsub.f32 1.0, %v429_v37  ;;  %vm448_vm12 = vweird.f32 %v407_v34 }
 0x212   : > { %v455_v63 = vor.u32 1.1754944e-38, %v454_v54  ;;  %vm453_vm14 = vcmp.eq.f32.partialorder %v452_v56, 8.507059e+37 }
 0x213   : > { %v431_v41 = vmul.f32 %v745_v33, %v430_v39 }
 0x214   : > { %v369_v43 = vpop.f32.mrf.mxu3 }
 0x215   : > { %v747_v44 = vpop.eup %746  ;;  %v683_v45 = vmul.f32 -1.442695, %v369_v43  ;;  %v432_v46 = vadd.f32 %v745_v33, %v431_v41 }
 0x216   : > { %v749_v47 = vpop.eup %748  ;;  %v408_v48 = vadd.f32 1.0, %v747_v44 }
 0x217   : > { %750 = vpow2.f32 %v683_v45  ;;  %v436_v50 = vsel %vm435_vm9, %v745_v33, %v432_v46  ;;  %v444_v51 = vmul.f32 %v749_v47, %v407_v34  ;;  %vm449_vm11 = vweird.f32 %v749_v47 }
 0x218   : > { %752 = vrcp.f32 %v408_v48  ;;  %v441_v52 = vsel %vm438_vm10, %v440_v49, %v436_v50  ;;  %vm450_vm13 = vmor %vm448_vm12, %vm449_vm11  ;;  %v469_v20 = vand.u32 2147483648, %v408_v48  ;;  %v467_v22 = vand.u32 2147483647, %v408_v48 }
 0x219   : > { %540 = vperm.xlu0 %733, %v441_v52   ;;  %v445_v53 = vsub.f32 1.0, %v444_v51  ;;  %vm463_vm0 = vweird.f32 %v408_v48 }
 0x21a   : > { %v470_v29 = vor.u32 1.1754944e-38, %v469_v20  ;;  %vm468_vm2 = vcmp.eq.f32.partialorder %v467_v22, 8.507059e+37 }
 0x21b   : > { %v446_v55 = vmul.f32 %v749_v47, %v445_v53 }
 0x21c   : > { %v372_v57 = vpop.f32.mrf.mxu3 }
 0x21d   : > { %v751_v58 = vpop.eup %750  ;;  %v684_v59 = vmul.f32 -1.442695, %v372_v57  ;;  %v447_v60 = vadd.f32 %v749_v47, %v446_v55 }
 0x21e   : > { %v753_v61 = vpop.eup %752  ;;  %v409_v62 = vadd.f32 1.0, %v751_v58 }
 0x21f   : > { %754 = vpow2.f32 %v684_v59  ;;  %v451_v0 = vsel %vm450_vm13, %v749_v47, %v447_v60  ;;  %v459_v17 = vmul.f32 %v753_v61, %v408_v48  ;;  %vm464_vm15 = vweird.f32 %v753_v61 }
 0x220   : > { %756 = vrcp.f32 %v409_v62  ;;  %v456_v18 = vsel %vm453_vm14, %v455_v63, %v451_v0  ;;  %vm465_vm1 = vmor %vm463_vm0, %vm464_vm15  ;;  %v484_v34 = vand.u32 2147483648, %v409_v62  ;;  %v482_v36 = vand.u32 2147483647, %v409_v62 }
 0x221   : > { %545 = vperm.xlu1 %734, %v456_v18   ;;  %v460_v19 = vsub.f32 1.0, %v459_v17  ;;  %vm478_vm4 = vweird.f32 %v409_v62 }
 0x222   : > { %v485_v43 = vor.u32 1.1754944e-38, %v484_v34  ;;  %vm483_vm6 = vcmp.eq.f32.partialorder %v482_v36, 8.507059e+37 }
 0x223   : > { %v461_v21 = vmul.f32 %v753_v61, %v460_v19 }
 0x224   : > { %v375_v23 = vpop.f32.mrf.mxu3 }
 0x225   : > { %v755_v24 = vpop.eup %754  ;;  %v685_v25 = vmul.f32 -1.442695, %v375_v23  ;;  %v462_v26 = vadd.f32 %v753_v61, %v461_v21 }
 0x226   : > { %v757_v27 = vpop.eup %756  ;;  %v410_v28 = vadd.f32 1.0, %v755_v24 }
 0x227   : > { %758 = vpow2.f32 %v685_v25  ;;  %v466_v30 = vsel %vm465_vm1, %v753_v61, %v462_v26  ;;  %v474_v31 = vmul.f32 %v757_v27, %v409_v62  ;;  %vm479_vm3 = vweird.f32 %v757_v27 }
 0x228   : > { %760 = vrcp.f32 %v410_v28  ;;  %v471_v32 = vsel %vm468_vm2, %v470_v29, %v466_v30  ;;  %vm480_vm5 = vmor %vm478_vm4, %vm479_vm3  ;;  %v499_v48 = vand.u32 2147483648, %v410_v28  ;;  %v497_v50 = vand.u32 2147483647, %v410_v28 }
 0x229   : > { %550 = vperm.xlu1 %734, %v471_v32   ;;  %v475_v33 = vsub.f32 1.0, %v474_v31  ;;  %vm493_vm8 = vweird.f32 %v410_v28 }
 0x22a   : > { %v500_v55 = vor.u32 1.1754944e-38, %v499_v48  ;;  %vm498_vm10 = vcmp.eq.f32.partialorder %v497_v50, 8.507059e+37 }
 0x22b   : > { %v476_v35 = vmul.f32 %v757_v27, %v475_v33 }
 0x22c   : > { %v378_v37 = vpop.f32.mrf.mxu3 }
 0x22d   : > { %v759_v38 = vpop.eup %758  ;;  %v686_v39 = vmul.f32 -1.442695, %v378_v37  ;;  %v477_v40 = vadd.f32 %v757_v27, %v476_v35 }
 0x22e   : > { %v761_v41 = vpop.eup %760  ;;  %v411_v42 = vadd.f32 1.0, %v759_v38 }
 0x22f   : > { %762 = vpow2.f32 %v686_v39  ;;  %v481_v44 = vsel %vm480_vm5, %v757_v27, %v477_v40  ;;  %v489_v45 = vmul.f32 %v761_v41, %v410_v28  ;;  %vm494_vm7 = vweird.f32 %v761_v41 }
 0x230   : > { %764 = vrcp.f32 %v411_v42  ;;  %v486_v46 = vsel %vm483_vm6, %v485_v43, %v481_v44  ;;  %vm495_vm9 = vmor %vm493_vm8, %vm494_vm7  ;;  %v514_v60 = vand.u32 2147483648, %v411_v42  ;;  %v512_v62 = vand.u32 2147483647, %v411_v42 }
 0x231   : > { %555 = vperm.xlu2 %735, %v486_v46   ;;  %v490_v47 = vsub.f32 1.0, %v489_v45  ;;  %vm508_vm12 = vweird.f32 %v411_v42 }
 0x232   : > { %v515_v17 = vor.u32 1.1754944e-38, %v514_v60  ;;  %vm513_vm14 = vcmp.eq.f32.partialorder %v512_v62, 8.507059e+37 }
 0x233   : > { %v491_v49 = vmul.f32 %v761_v41, %v490_v47 }
 0x235   : > { %v763_v51 = vpop.eup %762  ;;  %v492_v52 = vadd.f32 %v761_v41, %v491_v49 }
 0x236   : > { %v765_v53 = vpop.eup %764  ;;  %v412_v54 = vadd.f32 1.0, %v763_v51 }
 0x237   : > { %v496_v56 = vsel %vm495_vm9, %v761_v41, %v492_v52  ;;  %v504_v57 = vmul.f32 %v765_v53, %v411_v42  ;;  %vm509_vm11 = vweird.f32 %v765_v53 }
 0x238   : > { %766 = vrcp.f32 %v412_v54  ;;  %v501_v58 = vsel %vm498_vm10, %v500_v55, %v496_v56  ;;  %vm510_vm13 = vmor %vm508_vm12, %vm509_vm11  ;;  %v529_v22 = vand.u32 2147483648, %v412_v54  ;;  %v527_v24 = vand.u32 2147483647, %v412_v54 }
 0x239   : > { %560 = vperm.xlu2 %735, %v501_v58   ;;  %v505_v59 = vsub.f32 1.0, %v504_v57  ;;  %vm523_vm0 = vweird.f32 %v412_v54 }
 0x23a   : > { %v530_v26 = vor.u32 1.1754944e-38, %v529_v22  ;;  %vm528_vm2 = vcmp.eq.f32.partialorder %v527_v24, 8.507059e+37 }
 0x23b   : > { %v506_v61 = vmul.f32 %v765_v53, %v505_v59 }
 0x23d   : > { %v507_v63 = vadd.f32 %v765_v53, %v506_v61 }
 0x23e   : > { %v767_v0 = vpop.eup %766 }
 0x23f   : > { %v511_v18 = vsel %vm510_vm13, %v765_v53, %v507_v63  ;;  %v519_v19 = vmul.f32 %v767_v0, %v412_v54  ;;  %vm524_vm15 = vweird.f32 %v767_v0 }
 0x240   : > { %v516_v20 = vsel %vm513_vm14, %v515_v17, %v511_v18  ;;  %vm525_vm1 = vmor %vm523_vm0, %vm524_vm15 }
 0x241   : > { %565 = vperm.xlu0 %733, %v516_v20   ;;  %v520_v21 = vsub.f32 1.0, %v519_v19 }
 0x243   : > { %v521_v23 = vmul.f32 %v767_v0, %v520_v21 }
 0x245   : > { %v522_v25 = vadd.f32 %v767_v0, %v521_v23 }
 0x247   : > { %v526_v27 = vsel %vm525_vm1, %v767_v0, %v522_v25 }
 0x248   : > { %v531_v28 = vsel %vm528_vm2, %v530_v26, %v526_v27 }
 0x249   : > { %570 = vperm.xlu1 %734, %v531_v28  }
 0x283   : > { %v536_v29 = vpop.permute.xlu0 %535 }
 0x284   : > { %v573_v30 = vmul.f32 %v536_v29, %v866_v1  ;;  %v574_v31 = vmul.f32 %v536_v29, %v869_v2 }
 0x286   : > { %589 = vst [vmem:[%s988_s11] sm:$0xff] %v573_v30 }
 0x287   : > { %590 = vst [vmem:[%s988_s11 + $0x8] sm:$0xff] %v574_v31 }
 0x28b   : > { %v541_v32 = vpop.permute.xlu0 %540  ;;  %v556_v33 = vpop.permute.xlu2 %555 }
 0x28c   : > { %v575_v34 = vmul.f32 %v541_v32, %v885_v4  ;;  %v576_v35 = vmul.f32 %v541_v32, %v888_v5  ;;  %v581_v36 = vmul.f32 %v556_v33, %v928_v12  ;;  %v582_v37 = vmul.f32 %v556_v33, %v931_v13 }
 0x28e   : > { %591 = vst [vmem:[%s988_s11 + $0x10] sm:$0xff] %v575_v34 }
 0x28f   : > { %592 = vst [vmem:[%s988_s11 + $0x18] sm:$0xff] %v576_v35 }
 0x290   : > { %597 = vst [vmem:[%s988_s11 + $0x40] sm:$0xff] %v581_v36 }
 0x291   : > { %598 = vst [vmem:[%s988_s11 + $0x48] sm:$0xff] %v582_v37 }
 0x293   : > { %v546_v1 = vpop.permute.xlu1 %545  ;;  %v561_v2 = vpop.permute.xlu2 %560 }
 0x294   : > { %v577_v38 = vmul.f32 %v546_v1, %v901_v7  ;;  %v578_v4 = vmul.f32 %v546_v1, %v904_v8  ;;  %v583_v5 = vmul.f32 %v561_v2, %v940_v15  ;;  %v584_v12 = vmul.f32 %v561_v2, %v943_v16 }
 0x296   : > { %593 = vst [vmem:[%s988_s11 + $0x20] sm:$0xff] %v577_v38 }
 0x297   : > { %594 = vst [vmem:[%s988_s11 + $0x28] sm:$0xff] %v578_v4 }
 0x298   : > { %599 = vst [vmem:[%s988_s11 + $0x50] sm:$0xff] %v583_v5 }
 0x299   : > { %600 = vst [vmem:[%s988_s11 + $0x58] sm:$0xff] %v584_v12 }
 0x29b   : > { %v551_v13 = vpop.permute.xlu1 %550 }
 0x29c   : > { %v579_v39 = vmul.f32 %v551_v13, %v913_v9  ;;  %v580_v40 = vmul.f32 %v551_v13, %v916_v10 }
 0x29e   : > { %595 = vst [vmem:[%s988_s11 + $0x30] sm:$0xff] %v579_v39 }
 0x29f   : > { %596 = vst [vmem:[%s988_s11 + $0x38] sm:$0xff] %v580_v40 }
 0x2b3   : > { %v566_v7 = vpop.permute.xlu0 %565 }
 0x2b4   : > { %v585_v8 = vmul.f32 %v566_v7, %v876_v3  ;;  %v586_v15 = vmul.f32 %v566_v7, %v924_v11 }
 0x2b6   : > { %601 = vst [vmem:[%s988_s11 + $0x60] sm:$0xff] %v585_v8 }
 0x2b7   : > { %602 = vst [vmem:[%s988_s11 + $0x68] sm:$0xff] %v586_v15 }
 0x2bb   : > { %v571_v16 = vpop.permute.xlu1 %570 }
 0x2bc   : > { %v587_v41 = vmul.f32 %v571_v16, %v892_v6  ;;  %v588_v42 = vmul.f32 %v571_v16, %v937_v14 }
 0x2be   : > { %603 = vst [vmem:[%s988_s11 + $0x70] sm:$0xff] %v587_v41 }
 0x2bf   : > { %604 = vst [vmem:[%s988_s11 + $0x78] sm:$0xff] %v588_v42 }
 0x2c0 PF: > { %s13_s12 = sadd.s32 1, %s774_s12  }
 0x2c1   : > { %p10_p4 = scmp.ge.s32.totalorder %s13_s12, 4  }
 0x2c3   :  { %12 = sbr.rel (!%p10_p4) target bundleno = 1 (0x1), region = 62 }

</bundles_post_ra>
